<compile_context>
chip_gen: v5e
topology: v5e:2x2
jax: 0.10.0
libtpu: 0.0.40
codegen_flags: <defaults>
</compile_context>

<pallas_src>
import functools
import math
import numpy as np

import jax
import jax.numpy as jnp
from jax.experimental import pallas as pl
from jax.experimental.pallas import tpu as pltpu


_ROW_BLOCK = 8   # images per grid step (output sublane dim, multiple of 8)
_COL_CHUNK = 8   # source columns consumed per inner-loop step


# -----------------------------------------------------------------------------
# Pallas kernel: factored bilinear remap (chunked, on-the-fly weights)
# -----------------------------------------------------------------------------
def _remap_kernel(a_ref, par_ref, o_ref, *, col_chunk):
    """One (image-block, pixel-tile) grid point.

    a_ref  : (Wp*RB, H) bf16  transposed images, row = c*RB + r_local,
                              col = source row h  (resident across pixel tiles)
    par_ref: (4, TP)    f32   per-output-pixel taps: rows = yf, yv, xf, xv
    o_ref  : (RB, TP)   f32   flattened output pixels for this tile
    """
    rb, tp = o_ref.shape
    wprb, h = a_ref.shape
    wp = wprb // rb
    ch = col_chunk
    chrb = ch * rb

    par = par_ref[...]                       # (4, TP)
    yf = par[0:1, :].astype(jnp.int32)       # (1, TP) source row of the floor tap
    yv = par[1:2, :]                         # (1, TP) row fractional weight
    xf = par[2:3, :].astype(jnp.int32)       # (1, TP) source col of the floor tap
    xv = par[3:4, :]                         # (1, TP) col fractional weight

    # Row-tap weight tile RowW^T (H, TP), synthesized on the VPU, cast to bf16
    # for a single-pass MXU matmul.
    hh = jax.lax.broadcasted_iota(jnp.int32, (h, tp), 0)
    rwt = (jnp.where(hh == yf, 1.0 - yv, 0.0)
           + jnp.where(hh == yf + 1, yv, 0.0)).astype(jnp.bfloat16)   # (H, TP)

    def body(ci, acc):
        r0 = pl.multiple_of(ci * chrb, chrb)
        blk = a_ref[pl.ds(r0, chrb), :]                                # (CH*RB, H) bf16
        # tmp[c*RB + r, p] = sum_h img[r, h, c0+c] * RowW[p, h]        (MXU)
        t = jnp.dot(blk, rwt, preferred_element_type=jnp.float32)      # (CH*RB, TP)
        # Column-tap weights for this chunk of source columns.
        cc = jax.lax.broadcasted_iota(jnp.int32, (ch, tp), 0) + ci * ch
        w = (jnp.where(cc == xf, 1.0 - xv, 0.0)
             + jnp.where(cc == xf + 1, xv, 0.0))                       # (CH, TP) f32
        t3 = t.reshape(ch, rb, tp)
        # out[r, p] += sum_c ColW[p, c0+c] * tmp[c, r, p]              (VPU reduce)
        return acc + jnp.sum(t3 * w[:, None, :], axis=0)

    acc0 = jnp.zeros((rb, tp), jnp.float32)
    o_ref[...] = jax.lax.fori_loop(0, wp // ch, body, acc0, unroll=True)


def _pick_pixel_tile(P):
    # Lane-dense output tiles: TP is always a multiple of 128, capped at 1024
    # (fits comfortably in v7x's 64 MiB VMEM per the review).
    if P >= 1024:
        return 1024
    return ((P + 127) // 128) * 128


def _warp_params_np(dx, dy, n, m, p_pad):
    """Per-output-pixel bilinear tap parameters (yf, yv, xf, xv), padded to p_pad."""
    y, x = np.meshgrid(np.arange(n, dtype=np.float32),
                       np.arange(m, dtype=np.float32), indexing='ij')
    xn = np.clip(x - dx, 0.0, m - 1)
    yn = np.clip(y - dy, 0.0, n - 1)
    xf = np.floor(xn)
    yf = np.floor(yn)
    xv = (xn - xf).astype(np.float32)
    yv = (yn - yf).astype(np.float32)
    par = np.zeros((4, p_pad), np.float32)
    P = n * m
    par[0, :P] = yf.reshape(-1)
    par[1, :P] = yv.reshape(-1)
    par[2, :P] = xf.reshape(-1)
    par[3, :P] = xv.reshape(-1)
    return par


def remap_bilinear(img, dx, dy):
    """Pallas-backed equivalent of remap(a, dx, dy, interp='linear')."""
    lead = img.shape[:-2]
    n, m = img.shape[-2:]
    assert dx.shape == (n, m) and dy.shape == (n, m), \
        'Image(s) and displacement fields shapes should match.'
    R = int(np.prod(lead)) if lead else 1
    P = n * m

    RB = _ROW_BLOCK
    CH = _COL_CHUNK
    Rp = ((R + RB - 1) // RB) * RB
    Wp = ((m + CH - 1) // CH) * CH
    TP = _pick_pixel_tile(P)
    Pp = ((P + TP - 1) // TP) * TP

    # Per-pixel tap parameters (small: 4 * Pp floats) built on the host.
    par = _warp_params_np(np.asarray(dx, np.float32),
                          np.asarray(dy, np.float32), n, m, Pp)

    # Image layout: a[rbi, c*RB + r_local, h] = img[rbi*RB + r_local, h, c]
    x = jnp.asarray(img, jnp.float32).reshape(R, n, m)
    if Rp != R:
        x = jnp.concatenate([x, jnp.zeros((Rp - R, n, m), jnp.float32)], axis=0)
    xt = jnp.transpose(x, (2, 0, 1))                       # (W, Rp, H)
    if Wp != m:
        xt = jnp.concatenate(
            [xt, jnp.zeros((Wp - m, Rp, n), jnp.float32)], axis=0)
    a = xt.reshape(Wp, Rp // RB, RB, n)
    a = jnp.transpose(a, (1, 0, 2, 3)).reshape(Rp // RB, Wp * RB, n)
    a = a.astype(jnp.bfloat16)                             # bf16 MXU operand

    grid = (Rp // RB, Pp // TP)                            # pixel tile innermost
    if Rp // RB >= 2:
        dims = ("parallel", "arbitrary")   # shard disjoint image streams (v7x)
    else:
        dims = ("arbitrary", "parallel")

    out = pl.pallas_call(
        functools.partial(_remap_kernel, col_chunk=CH),
        out_shape=jax.ShapeDtypeStruct((Rp, Pp), jnp.float32),
        grid=grid,
        in_specs=[
            # Image block: constant across the inner pixel-tile axis -> DMA'd
            # once per image block.
            pl.BlockSpec((None, Wp * RB, n), lambda rb, pt: (rb, 0, 0)),
            # Per-pixel tap parameters for this pixel tile (tiny).
            pl.BlockSpec((4, TP), lambda rb, pt: (0, pt)),
        ],
        out_specs=pl.BlockSpec((RB, TP), lambda rb, pt: (rb, pt)),
        compiler_params=pltpu.CompilerParams(
            dimension_semantics=dims,
            vmem_limit_bytes=32 * 1024 * 1024),
    )(a, jnp.asarray(par))

    out = out[:R, :P].reshape(R, n, m)
    return out.reshape(*lead, n, m) if lead else out.reshape(n, m)


# -----------------------------------------------------------------------------
# Host-side glue: random scalar field + temperature range (data-dependent shapes)
# -----------------------------------------------------------------------------
def _scalar_field_np(n, cut, rng):
    """Random scalar field of size n x n made of the first `cut` sine modes."""
    x = np.linspace(0.0, 1.0, n, dtype=np.float32)
    k = np.arange(1, cut + 1, dtype=np.float32)
    i, j = np.meshgrid(k, k, indexing='ij')
    r = np.sqrt(i ** 2 + j ** 2)
    e = (r < cut + 0.5).astype(np.float32) / r
    s = np.sin(np.pi * x[:, None] * k[None, :]).astype(np.float32)
    c = rng.standard_normal((cut, cut)).astype(np.float32) * e
    # contract('ij,xi,yj->yx', c, s, s)
    return np.einsum('ij,xi,yj->yx', c, s, s).astype(np.float32)


def temperature_range(n, cut):
    cut = cut + 1e-6
    log = math.log(cut)
    T1 = 1.0 / (math.pi * n ** 2 * log)
    T2 = 4.0 / (math.pi ** 3 * cut ** 2 * log)
    return T1, T2


class Diffeo:
    """Randomly apply a diffeomorphism to square image(s) [..., n, n]."""

    def __init__(self, sT, rT, scut, rcut, cutmin, cutmax, alpha,
                 stochastic=False, seed=0):
        self.sT, self.rT = sT, rT
        self.scut, self.rcut = scut, rcut
        self.cutmin, self.cutmax = cutmin, cutmax
        self.alpha = alpha
        self.stochastic = stochastic
        if stochastic:
            self.cutmax_max = cutmax
            self.alpha_max = alpha
        self._aT = sT - sT / (rT + 1)
        self._bT = sT / (rT + 1)
        self._acut = scut - scut / (rcut + 1)
        self._bcut = scut / (rcut + 1)
        self._rng = np.random.default_rng(seed)

    def _sample_params(self):
        self.cutmax = int(self._rng.integers(self.cutmin + 1,
                                             self.cutmax_max + 1))

    def __call__(self, img):
        init_shape = img.shape
        if img.ndim < 4:
            img = img[None]                       # 'c h w -> () c h w'
        n = img.shape[-1]
        assert img.shape[-2] == n, 'Image(s) should be square.'
        if self.stochastic:
            self._sample_params()
        # TODO(synk): Beta/randint parameter sampling and the cut x cut
        # scalar-field mode synthesis stay on the host: `cut` is sampled per
        # call and sets array shapes, which a static Pallas grid cannot express.
        cut = int(self._rng.beta(self._acut, self._bcut)
                  * (self.cutmax + 1 - self.cutmin) + self.cutmin)
        T1, T2 = temperature_range(n, cut)
        T2 = max(T1, self.alpha * T2)
        T = float(self._rng.beta(self._aT, self._bT) * (T2 - T1) + T1)
        u = _scalar_field_np(n, cut, self._rng)
        v = _scalar_field_np(n, cut, self._rng)
        dx = (T ** 0.5) * u * n
        dy = (T ** 0.5) * v * n
        out = remap_bilinear(img, dx, dy)
        return out.reshape(init_shape)


# -----------------------------------------------------------------------------
# NumPy reference of the bilinear remap (for validation only)
# -----------------------------------------------------------------------------
def _remap_reference_np(a, dx, dy):
    n, m = a.shape[-2:]
    y, x = np.meshgrid(np.arange(n, dtype=np.float32),
                       np.arange(m, dtype=np.float32), indexing='ij')
    xn = np.clip(x - dx, 0.0, m - 1)
    yn = np.clip(y - dy, 0.0, n - 1)
    xf = np.floor(xn).astype(np.int64)
    xc = np.ceil(xn).astype(np.int64)
    yf = np.floor(yn).astype(np.int64)
    yc = np.ceil(yn).astype(np.int64)
    xv = xn - xf
    yv = yn - yf
    return ((1 - yv) * (1 - xv) * a[..., yf, xf]
            + (1 - yv) * xv * a[..., yf, xc]
            + yv * (1 - xv) * a[..., yc, xf]
            + yv * xv * a[..., yc, xc])


# -----------------------------------------------------------------------------
if __name__ == "__main__":
    key = jax.random.PRNGKey(0)
    B, C, H, W = 2, 4, 16, 16
    img = jax.random.uniform(key, (B, C, H, W), dtype=jnp.float32)

    # 1) Numerical check of the Pallas remap against the NumPy reference warp.
    chk_rng = np.random.default_rng(123)
    dx = (chk_rng.standard_normal((H, W)) * 1.5).astype(np.float32)
    dy = (chk_rng.standard_normal((H, W)) * 1.5).astype(np.float32)
    got = np.asarray(jax.block_until_ready(remap_bilinear(img, dx, dy)))
    ref = _remap_reference_np(np.asarray(img), dx, dy)
    assert got.shape == ref.shape
    # bf16 image/weight operands: expected error ~5e-3; tolerance tightened
    # from the previous 2e-2 so the bf16 path is validated meaningfully.
    assert np.allclose(got, ref, atol=1e-2, rtol=1e-2), \
        float(np.max(np.abs(got - ref)))

    # 2) Full Diffeo forward (stochastic parameters, deterministic seed).
    diffeo = Diffeo(sT=1.0, rT=1.0, scut=1.0, rcut=1.0,
                    cutmin=2, cutmax=100, alpha=1.0, stochastic=True, seed=0)
    out = jax.block_until_ready(diffeo(img))

    assert out.shape == (B, C, H, W), out.shape
    assert out.dtype == jnp.float32
    assert bool(jnp.all(jnp.isfinite(out)))
    print("KERNEL_OK")
</pallas_src>

<mosaic_0001>
module attributes {stable_mosaic.version = 11 : i64} {
  func.func @_remap_kernel(%arg0: i32, %arg1: i32, %arg2: memref<1x128x16xbf16, #tpu.memory_space<vmem>>, %arg3: memref<4x256xf32, #tpu.memory_space<vmem>>, %arg4: memref<8x256xf32, #tpu.memory_space<vmem>>) attributes {dimension_semantics = [#tpu.dimension_semantics<arbitrary>, #tpu.dimension_semantics<parallel>], iteration_bounds = array<i64: 1, 1>, scalar_prefetch = 0 : i64, scratch_operands = 0 : i64, tpu.core_type = #tpu.core_type<tc>, window_params = [{transform_indices = @transform_0, window_bounds = array<i64: 1, 128, 16>}, {transform_indices = @transform_1, window_bounds = array<i64: 4, 256>}, {transform_indices = @transform_2, window_bounds = array<i64: 8, 256>}]} {
    %c0 = arith.constant 0 : index
    %c0_0 = arith.constant 0 : index
    %0 = vector.load %arg3[%c0, %c0_0] : memref<4x256xf32, #tpu.memory_space<vmem>>, vector<4x256xf32>
    %1 = vector.extract_strided_slice %0 {offsets = [0, 0], sizes = [1, 256], strides = [1, 1]} : vector<4x256xf32> to vector<1x256xf32>
    %2 = arith.fptosi %1 : vector<1x256xf32> to vector<1x256xi32>
    %3 = vector.extract_strided_slice %0 {offsets = [1, 0], sizes = [1, 256], strides = [1, 1]} : vector<4x256xf32> to vector<1x256xf32>
    %4 = vector.extract_strided_slice %0 {offsets = [2, 0], sizes = [1, 256], strides = [1, 1]} : vector<4x256xf32> to vector<1x256xf32>
    %5 = arith.fptosi %4 : vector<1x256xf32> to vector<1x256xi32>
    %6 = vector.extract_strided_slice %0 {offsets = [3, 0], sizes = [1, 256], strides = [1, 1]} : vector<4x256xf32> to vector<1x256xf32>
    %7 = tpu.iota {dimensions = array<i32: 0>} : vector<16x256xi32>
    %8 = vector.broadcast %2 : vector<1x256xi32> to vector<16x256xi32>
    %9 = arith.cmpi eq, %7, %8 : vector<16x256xi32>
    %cst = arith.constant 1.000000e+00 : f32
    %10 = vector.broadcast %cst : f32 to vector<1x256xf32>
    %11 = arith.subf %10, %3 : vector<1x256xf32>
    %cst_1 = arith.constant 0.000000e+00 : f32
    %12 = vector.shape_cast %11 : vector<1x256xf32> to vector<1x256xf32>
    %13 = vector.broadcast %12 : vector<1x256xf32> to vector<16x256xf32>
    %14 = vector.broadcast %cst_1 : f32 to vector<16x256xf32>
    %15 = arith.select %9, %13, %14 : vector<16x256xi1>, vector<16x256xf32>
    %c1_i32 = arith.constant 1 : i32
    %16 = vector.broadcast %c1_i32 : i32 to vector<1x256xi32>
    %17 = arith.addi %2, %16 : vector<1x256xi32>
    %18 = vector.broadcast %17 : vector<1x256xi32> to vector<16x256xi32>
    %19 = arith.cmpi eq, %7, %18 : vector<16x256xi32>
    %cst_2 = arith.constant 0.000000e+00 : f32
    %20 = vector.shape_cast %3 : vector<1x256xf32> to vector<1x256xf32>
    %21 = vector.broadcast %20 : vector<1x256xf32> to vector<16x256xf32>
    %22 = vector.broadcast %cst_2 : f32 to vector<16x256xf32>
    %23 = arith.select %19, %21, %22 : vector<16x256xi1>, vector<16x256xf32>
    %24 = arith.addf %15, %23 : vector<16x256xf32>
    %25 = arith.truncf %24 : vector<16x256xf32> to vector<16x256xbf16>
    %cst_3 = arith.constant 0.000000e+00 : f32
    %26 = vector.broadcast %cst_3 : f32 to vector<8x256xf32>
    %c0_i32 = arith.constant 0 : i32
    %c64_i32 = arith.constant 64 : i32
    %27 = arith.muli %c0_i32, %c64_i32 : i32
    %28 = tpu.assume_multiple %27, 64 : i32
    %c0_4 = arith.constant 0 : index
    %29 = arith.index_cast %28 : i32 to index
    %c0_5 = arith.constant 0 : index
    %30 = vector.load %arg2[%c0_4, %29, %c0_5] : memref<1x128x16xbf16, #tpu.memory_space<vmem>>, vector<1x64x16xbf16>
    %31 = vector.shape_cast %30 : vector<1x64x16xbf16> to vector<64x16xbf16>
    %cst_6 = arith.constant dense<0.000000e+00> : vector<64x256xf32>
    %32 = tpu.matmul %31, %25, %cst_6 {dimension_numbers = #tpu.dot_dimension_numbers<[1], [0], [0], [1], [0, 0, 1, 1], [], []>} : vector<64x16xbf16>, vector<16x256xbf16>, vector<64x256xf32> -> vector<64x256xf32>
    %33 = tpu.iota {dimensions = array<i32: 0>} : vector<8x256xi32>
    %c8_i32 = arith.constant 8 : i32
    %34 = arith.muli %c0_i32, %c8_i32 : i32
    %35 = vector.broadcast %34 : i32 to vector<8x256xi32>
    %36 = arith.addi %33, %35 : vector<8x256xi32>
    %37 = vector.broadcast %5 : vector<1x256xi32> to vector<8x256xi32>
    %38 = arith.cmpi eq, %36, %37 : vector<8x256xi32>
    %cst_7 = arith.constant 1.000000e+00 : f32
    %39 = vector.broadcast %cst_7 : f32 to vector<1x256xf32>
    %40 = arith.subf %39, %6 : vector<1x256xf32>
    %cst_8 = arith.constant 0.000000e+00 : f32
    %41 = vector.shape_cast %40 : vector<1x256xf32> to vector<1x256xf32>
    %42 = vector.broadcast %41 : vector<1x256xf32> to vector<8x256xf32>
    %43 = vector.broadcast %cst_8 : f32 to vector<8x256xf32>
    %44 = arith.select %38, %42, %43 : vector<8x256xi1>, vector<8x256xf32>
    %c1_i32_9 = arith.constant 1 : i32
    %45 = vector.broadcast %c1_i32_9 : i32 to vector<1x256xi32>
    %46 = arith.addi %5, %45 : vector<1x256xi32>
    %47 = vector.broadcast %46 : vector<1x256xi32> to vector<8x256xi32>
    %48 = arith.cmpi eq, %36, %47 : vector<8x256xi32>
    %cst_10 = arith.constant 0.000000e+00 : f32
    %49 = vector.shape_cast %6 : vector<1x256xf32> to vector<1x256xf32>
    %50 = vector.broadcast %49 : vector<1x256xf32> to vector<8x256xf32>
    %51 = vector.broadcast %cst_10 : f32 to vector<8x256xf32>
    %52 = arith.select %48, %50, %51 : vector<8x256xi1>, vector<8x256xf32>
    %53 = arith.addf %44, %52 : vector<8x256xf32>
    %54 = vector.shape_cast %32 : vector<64x256xf32> to vector<8x8x256xf32>
    %55 = vector.shape_cast %53 : vector<8x256xf32> to vector<8x1x256xf32>
    %56 = vector.broadcast %55 : vector<8x1x256xf32> to vector<8x8x256xf32>
    %57 = arith.mulf %54, %56 : vector<8x8x256xf32>
    %cst_11 = arith.constant dense<0.000000e+00> : vector<8x256xf32>
    %58 = vector.multi_reduction <add>, %57, %cst_11 [0] : vector<8x8x256xf32> to vector<8x256xf32>
    %59 = arith.addf %26, %58 : vector<8x256xf32>
    %c1_i32_12 = arith.constant 1 : i32
    %c64_i32_13 = arith.constant 64 : i32
    %60 = arith.muli %c1_i32_12, %c64_i32_13 : i32
    %61 = tpu.assume_multiple %60, 64 : i32
    %c0_14 = arith.constant 0 : index
    %62 = arith.index_cast %61 : i32 to index
    %c0_15 = arith.constant 0 : index
    %63 = vector.load %arg2[%c0_14, %62, %c0_15] : memref<1x128x16xbf16, #tpu.memory_space<vmem>>, vector<1x64x16xbf16>
    %64 = vector.shape_cast %63 : vector<1x64x16xbf16> to vector<64x16xbf16>
    %cst_16 = arith.constant dense<0.000000e+00> : vector<64x256xf32>
    %65 = tpu.matmul %64, %25, %cst_16 {dimension_numbers = #tpu.dot_dimension_numbers<[1], [0], [0], [1], [0, 0, 1, 1], [], []>} : vector<64x16xbf16>, vector<16x256xbf16>, vector<64x256xf32> -> vector<64x256xf32>
    %66 = tpu.iota {dimensions = array<i32: 0>} : vector<8x256xi32>
    %c8_i32_17 = arith.constant 8 : i32
    %67 = arith.muli %c1_i32_12, %c8_i32_17 : i32
    %68 = vector.broadcast %67 : i32 to vector<8x256xi32>
    %69 = arith.addi %66, %68 : vector<8x256xi32>
    %70 = vector.broadcast %5 : vector<1x256xi32> to vector<8x256xi32>
    %71 = arith.cmpi eq, %69, %70 : vector<8x256xi32>
    %cst_18 = arith.constant 1.000000e+00 : f32
    %72 = vector.broadcast %cst_18 : f32 to vector<1x256xf32>
    %73 = arith.subf %72, %6 : vector<1x256xf32>
    %cst_19 = arith.constant 0.000000e+00 : f32
    %74 = vector.shape_cast %73 : vector<1x256xf32> to vector<1x256xf32>
    %75 = vector.broadcast %74 : vector<1x256xf32> to vector<8x256xf32>
    %76 = vector.broadcast %cst_19 : f32 to vector<8x256xf32>
    %77 = arith.select %71, %75, %76 : vector<8x256xi1>, vector<8x256xf32>
    %c1_i32_20 = arith.constant 1 : i32
    %78 = vector.broadcast %c1_i32_20 : i32 to vector<1x256xi32>
    %79 = arith.addi %5, %78 : vector<1x256xi32>
    %80 = vector.broadcast %79 : vector<1x256xi32> to vector<8x256xi32>
    %81 = arith.cmpi eq, %69, %80 : vector<8x256xi32>
    %cst_21 = arith.constant 0.000000e+00 : f32
    %82 = vector.shape_cast %6 : vector<1x256xf32> to vector<1x256xf32>
    %83 = vector.broadcast %82 : vector<1x256xf32> to vector<8x256xf32>
    %84 = vector.broadcast %cst_21 : f32 to vector<8x256xf32>
    %85 = arith.select %81, %83, %84 : vector<8x256xi1>, vector<8x256xf32>
    %86 = arith.addf %77, %85 : vector<8x256xf32>
    %87 = vector.shape_cast %65 : vector<64x256xf32> to vector<8x8x256xf32>
    %88 = vector.shape_cast %86 : vector<8x256xf32> to vector<8x1x256xf32>
    %89 = vector.broadcast %88 : vector<8x1x256xf32> to vector<8x8x256xf32>
    %90 = arith.mulf %87, %89 : vector<8x8x256xf32>
    %cst_22 = arith.constant dense<0.000000e+00> : vector<8x256xf32>
    %91 = vector.multi_reduction <add>, %90, %cst_22 [0] : vector<8x8x256xf32> to vector<8x256xf32>
    %92 = arith.addf %59, %91 : vector<8x256xf32>
    %c2_i32 = arith.constant 2 : i32
    %c0_23 = arith.constant 0 : index
    %c0_24 = arith.constant 0 : index
    %93 = vector.load %arg4[%c0_23, %c0_24] : memref<8x256xf32, #tpu.memory_space<vmem>>, vector<8x256xf32>
    tpu.vector_store %arg4[%c0_23, %c0_24], %92 {strides = array<i32>} : memref<8x256xf32, #tpu.memory_space<vmem>>, vector<8x256xf32>,
    return
  }
  func.func @transform_0(%arg0: i32, %arg1: i32) -> (i32, i32, i32) {
    %c0_i32 = arith.constant 0 : i32
    %c0_i32_0 = arith.constant 0 : i32
    %c0_i32_1 = arith.constant 0 : i32
    return %arg0, %c0_i32, %c0_i32_0 : i32, i32, i32
  }
  func.func @transform_1(%arg0: i32, %arg1: i32) -> (i32, i32) {
    %c0_i32 = arith.constant 0 : i32
    %c0_i32_0 = arith.constant 0 : i32
    return %c0_i32, %arg1 : i32, i32
  }
  func.func @transform_2(%arg0: i32, %arg1: i32) -> (i32, i32) {
    %c0_i32 = arith.constant 0 : i32
    return %arg0, %arg1 : i32, i32
  }
}

</mosaic_0001>

<bundles_post_ra>
// kernel: tpu_custom_call.1
= control target key start
LH: loop header
LB: loop body
LE: loop exit
PB: predicated region body
PF: predicated region fallthrough
CT: control target
= control target key end

     0   :  { %v15_v1 = vlaneseq  ;;  %s816_s0 = inlined_call_operand.vmem [shape: bf16[1,128,16], index: 0, kind: input, shape index: {}]   ;;  %s817_s1 = inlined_call_operand.vmem [shape: f32[4,256], index: 1, kind: input, shape index: {}]   ;;  %s818_s2 = inlined_call_operand.hbm [shape: f32[8,256], index: 2, kind: output, shape index: {}]  }
   0x1   :  { %v607_v0 = vld [vmem:[%s817_s1] sm:$0xff] }
   0x2   :  { %vm556_vm0 = vcmp.lt.s32.totalorder %v607_v0, 0  ;;  %v557_v2 = vceil.f32 %v607_v0  ;;  %v558_v3 = vfloor.f32 %v607_v0  ;;  %v613_v4 = vsub.f32 1.0, %v607_v0 }
   0x3   :  { %7 = vsyncpa [#allocation3], 0  ;;  %v615_v5 = vshrl.u32 %v15_v1, 7  ;;  %v48_v9 = vperm.slane %v607_v0, 1  ;;  %v49_v16 = vperm.slane %v607_v0, 5  ;;  %v548_v39 = vld [vmem:[%s816_s0] sm:$0xff] }
   0x4   :  { %v559_v6 = vsel %vm556_vm0, %v557_v2, %v558_v3  ;;  %v28_v7 = vperm.slane %v613_v4, 1  ;;  %v29_v10 = vperm.slane %v613_v4, 5  ;;  %v552_v40 = vld [vmem:[%s816_s0 + $0x20] sm:$0xff]  ;;  %vm92_vm9 = vcmask 130048   ;;  %v549_v42 = vld [vmem:[%s816_s0 + $0x8] sm:$0xff]  ;;  %v550_v44 = vld [vmem:[%s816_s0 + $0x10] sm:$0xff] }
   0x5   :  { %v618_v8 = vcvt.f32.s32 %v559_v6  ;;  %v623_v11 = vadd.s32 8, %v615_v5  ;;  %v52_v21 = vperm.slane %v48_v9, 1  ;;  %v53_v26 = vperm.slane %v49_v16, 1  ;;  %v553_v43 = vld [vmem:[%s816_s0 + $0x28] sm:$0xff]  ;;  %v554_v45 = vld [vmem:[%s816_s0 + $0x30] sm:$0xff]  ;;  %v551_v46 = vld [vmem:[%s816_s0 + $0x18] sm:$0xff] }
   0x6   :  { %v32_v15 = vperm.slane %v28_v7, 1  ;;  %v33_v22 = vperm.slane %v29_v10, 1  ;;  %v555_v47 = vld [vmem:[%s816_s0 + $0x38] sm:$0xff]  ;;  %v170_v56 = vperm.slane %v613_v4, 7  ;;  %v184_v58 = vperm.slane %v607_v0, 7  ;;  %s588_s0 = smov [#allocation2]  }
   0x7   :  { %v18_v12 = vperm.slane %v618_v8, 0  ;;  %v627_v13 = vadd.s32 1, %v618_v8  ;;  %v19_v14 = vperm.slane %v618_v8, 4  ;;  %v164_v51 = vperm.slane %v618_v8, 6  ;;  %s481_s26 = sshll.u32 %s588_s0, 4  ;;  %s483_s29 = sshll.u32 %s818_s2, 4  ;;  %s482_s26 = int_to_ptr.vmem [resolvable:$true] %s481_s26  ;;  %s484_s29 = int_to_ptr.hbm [resolvable:$true] %s483_s29 }
   0x8   :  { %v163_v59 = vperm.slane %v618_v8, 2  ;;  %v169_v63 = vperm.slane %v613_v4, 3  ;;  %v174_v1 = vperm.slane %v170_v56, 3  ;;  %v183_v2 = vperm.slane %v607_v0, 3 }
   0x9   :  { %v20_v17 = vperm.slane %v18_v12, 0  ;;  %v39_v18 = vperm.slane %v627_v13, 0  ;;  %v21_v19 = vperm.slane %v19_v14, 0  ;;  %v40_v20 = vperm.slane %v627_v13, 4 }
   0xa   :  { %v178_v54 = vperm.slane %v627_v13, 6  ;;  %v166_v57 = vperm.slane %v164_v51, 2  ;;  %v177_v60 = vperm.slane %v627_v13, 2  ;;  %v188_v3 = vperm.slane %v184_v58, 3 }
   0xb   :  { %vm22_vm1 = vcmp.eq.s32.totalorder %v615_v5, %v20_v17  ;;  %vm24_vm2 = vcmp.eq.s32.totalorder %v623_v11, %v20_v17  ;;  %v41_v23 = vperm.slane %v39_v18, 0  ;;  %vm23_vm3 = vcmp.eq.s32.totalorder %v615_v5, %v21_v19 }
   0xc   :  { %v34_v24 = vsel %vm22_vm1, %v32_v15, 0.0  ;;  %v36_v25 = vsel %vm24_vm2, %v32_v15, 0.0  ;;  %vm25_vm4 = vcmp.eq.s32.totalorder %v623_v11, %v21_v19  ;;  %v42_v27 = vperm.slane %v40_v20, 0 }
   0xd   :  { %vm43_vm5 = vcmp.eq.s32.totalorder %v615_v5, %v41_v23  ;;  %vm45_vm6 = vcmp.eq.s32.totalorder %v623_v11, %v41_v23  ;;  %v35_v30 = vsel %vm23_vm3, %v33_v22, 0.0  ;;  %v37_v31 = vsel %vm25_vm4, %v33_v22, 0.0 }
   0xe   :  { %v54_v28 = vsel %vm43_vm5, %v52_v21, 0.0  ;;  %v56_v29 = vsel %vm45_vm6, %v52_v21, 0.0  ;;  %vm44_vm7 = vcmp.eq.s32.totalorder %v615_v5, %v42_v27  ;;  %vm46_vm8 = vcmp.eq.s32.totalorder %v623_v11, %v42_v27 }
   0xf   :  { %v58_v32 = vadd.f32 %v54_v28, %v34_v24  ;;  %v60_v33 = vadd.f32 %v56_v29, %v36_v25  ;;  %v55_v34 = vsel %vm44_vm7, %v53_v26, 0.0  ;;  %v57_v35 = vsel %vm46_vm8, %v53_v26, 0.0 }
  0x10   :  { %v59_v37 = vadd.f32 %v55_v34, %v35_v30  ;;  %v61_v38 = vadd.f32 %v57_v35, %v37_v31  ;;  %v180_v61 = vperm.slane %v178_v54, 2  ;;  %vm168_vm10 = vcmp.eq.s32.totalorder %v615_v5, %v166_v57 }
  0x11   :  { %v62_v36 = vpack.c.bf16 %v60_v33, %v58_v32  ;;  %v165_v9 = vperm.slane %v163_v59, 2  ;;  %v179_v10 = vperm.slane %v177_v60, 2  ;;  %v173_v12 = vperm.slane %v169_v63, 3 }
  0x12   :  { %v63_v41 = vpack.c.bf16 %v61_v38, %v59_v37  ;;  %vm182_vm11 = vcmp.eq.s32.totalorder %v615_v5, %v180_v61  ;;  %v176_v13 = vsel %vm168_vm10, %v174_v1, 0.0  ;;  %v187_v14 = vperm.slane %v183_v2, 3 }
  0x13   :  { %112 = vmatpush.bf16.msra.mxu0 %v62_v36  ;;  %331 = vmatpush.bf16.msra.mxu2 %v62_v36  ;;  %v190_v4 = vsel %vm182_vm11, %v188_v3, 0.0  ;;  %vm383_vm12 = vcmp.eq.s32.totalorder %v623_v11, %v166_v57  ;;  %vm387_vm13 = vcmp.eq.s32.totalorder %v623_v11, %v180_v61  ;;  %vm167_vm14 = vcmp.eq.s32.totalorder %v615_v5, %v165_v9 }
  0x14   :  { %141 = vmatpush.bf16.msra.mxu1 %v63_v41  ;;  %360 = vmatpush.bf16.msra.mxu3 %v63_v41  ;;  %vm181_vm15 = vcmp.eq.s32.totalorder %v615_v5, %v179_v10  ;;  %v192_v15 = vadd.f32 %v190_v4, %v176_v13  ;;  %v385_v16 = vsel %vm383_vm12, %v174_v1, 0.0  ;;  %v389_v17 = vsel %vm387_vm13, %v188_v3, 0.0 }
  0x15   :  { %v175_v18 = vsel %vm167_vm14, %v173_v12, 0.0  ;;  %v189_v19 = vsel %vm181_vm15, %v187_v14, 0.0  ;;  %vm382_vm0 = vcmp.eq.s32.totalorder %v623_v11, %v165_v9  ;;  %vm386_vm1 = vcmp.eq.s32.totalorder %v623_v11, %v179_v10 }
  0x16   :  { %508 = vmatmul.msk.bf16.vlgmr.msra.gmra.mxu0 %vm92_vm9, %v548_v39  ;;  %540 = vmatmul.msk.bf16.vlgmr.msra.gmra.mxu2 %vm92_vm9, %v552_v40  ;;  %v391_v22 = vadd.f32 %v389_v17, %v385_v16  ;;  %v725_v24 = vadd.f32 %v189_v19, %v175_v18  ;;  %v727_v5 = vrot.slane %v192_v15, 7  ;;  %v384_v25 = vsel %vm382_vm0, %v173_v12, 0.0 }
  0x17   :  { %512 = vmatmul.msk.bf16.vlgmr.msra.gmra.mxu1 %vm92_vm9, %v548_v39  ;;  %544 = vmatmul.msk.bf16.vlgmr.msra.gmra.mxu3 %vm92_vm9, %v552_v40  ;;  %v388_v26 = vsel %vm386_vm1, %v187_v14, 0.0  ;;  %vm198_vm2 = vcmask 1041409   ;;  %vm196_vm3 = vcmask 1040384   ;;  %vm201_vm4 = vcmask 1042434  }
  0x18   :  { %v729_v27 = vadd.f32 %v388_v26, %v384_v25  ;;  %v731_v28 = vrot.slane %v391_v22, 7  ;;  %v199_v29 = vsel %vm198_vm2, %v725_v24, %v727_v5  ;;  %vm204_vm5 = vcmask 1043459  }
  0x19   :  { %v197_v33 = vsel %vm196_vm3, %v725_v24, %v727_v5  ;;  %v202_v34 = vsel %vm201_vm4, %v725_v24, %v727_v5  ;;  %v200_v35 = vrot.slane %v199_v29, 1  ;;  %vm207_vm6 = vcmask 1044484  }
  0x1a   :  { %v396_v30 = vsel %vm198_vm2, %v729_v27, %v731_v28  ;;  %v398_v36 = vsel %vm201_vm4, %v729_v27, %v731_v28  ;;  %v205_v39 = vsel %vm204_vm5, %v725_v24, %v727_v5  ;;  %v400_v40 = vsel %vm204_vm5, %v729_v27, %v731_v28 }
  0x1b   :  { %v397_v38 = vrot.slane %v396_v30, 1  ;;  %v219_v41 = vperm.slane %v197_v33, 0  ;;  %vm210_vm7 = vcmask 1045509   ;;  %v222_v51 = vperm.slane %v200_v35, 1 }
  0x1c   :  { %v206_v54 = vrot.slane %v205_v39, 3  ;;  %v401_v56 = vrot.slane %v400_v40, 3  ;;  %v402_v61 = vsel %vm207_vm6, %v729_v27, %v731_v28  ;;  %v211_v10 = vsel %vm210_vm7, %v725_v24, %v727_v5 }
  0x1d   :  { %v412_v60 = vperm.slane %v397_v38, 0  ;;  %v413_v63 = vperm.slane %v397_v38, 1  ;;  %vm213_vm8 = vcmask 1046534   ;;  %v403_v17 = vrot.slane %v402_v61, 4 }
  0x1e   :  { %v225_v4 = vperm.slane %v206_v54, 0  ;;  %v226_v15 = vperm.slane %v206_v54, 1  ;;  %v416_v16 = vperm.slane %v401_v56, 0  ;;  %v417_v22 = vperm.slane %v401_v56, 1 }
  0x1f   :  { %v212_v25 = vrot.slane %v211_v10, 5  ;;  %v404_v26 = vsel %vm210_vm7, %v729_v27, %v731_v28  ;;  %v418_v39 = vperm.slane %v403_v17, 0 }
  0x26   :  { %509 = vmatmul.msk.bf16.gmra.mxu0 %vm92_vm9, %v549_v42  ;;  %541 = vmatmul.msk.bf16.gmra.mxu2 %vm92_vm9, %v553_v43 }
  0x27   :  { %513 = vmatmul.msk.bf16.gmra.mxu1 %vm92_vm9, %v549_v42  ;;  %545 = vmatmul.msk.bf16.gmra.mxu3 %vm92_vm9, %v553_v43  ;;  %v395_v42 = vsel %vm196_vm3, %v729_v27, %v731_v28  ;;  %v203_v43 = vrot.slane %v202_v34, 2  ;;  %v214_v34 = vsel %vm213_vm8, %v725_v24, %v727_v5 }
  0x28   :  { %v410_v58 = vperm.slane %v395_v42, 0  ;;  %v411_v59 = vperm.slane %v395_v42, 1 }
  0x29   :  { %v223_v1 = vperm.slane %v203_v43, 0  ;;  %v224_v12 = vperm.slane %v203_v43, 1  ;;  %v419_v43 = vperm.slane %v403_v17, 1 }
  0x36   :  { %510 = vmatmul.msk.bf16.gmra.mxu0 %vm92_vm9, %v550_v44  ;;  %542 = vmatmul.msk.bf16.gmra.mxu2 %vm92_vm9, %v554_v45 }
  0x37   :  { %514 = vmatmul.msk.bf16.gmra.mxu1 %vm92_vm9, %v550_v44  ;;  %546 = vmatmul.msk.bf16.gmra.mxu3 %vm92_vm9, %v554_v45  ;;  %v220_v44 = vperm.slane %v197_v33, 1  ;;  %v399_v45 = vrot.slane %v398_v36, 2 }
  0x39   :  { %v414_v13 = vperm.slane %v399_v45, 0  ;;  %v415_v14 = vperm.slane %v399_v45, 1  ;;  %v215_v45 = vrot.slane %v214_v34, 6 }
  0x46   :  { %511 = vmatmul.msk.bf16.gmra.mxu0 %vm92_vm9, %v551_v46  ;;  %543 = vmatmul.msk.bf16.gmra.mxu2 %vm92_vm9, %v555_v47 }
  0x47   :  { %515 = vmatmul.msk.bf16.gmra.mxu1 %vm92_vm9, %v551_v46  ;;  %547 = vmatmul.msk.bf16.gmra.mxu3 %vm92_vm9, %v555_v47  ;;  %v208_v46 = vsel %vm207_vm6, %v725_v24, %v727_v5  ;;  %v221_v47 = vperm.slane %v200_v35, 0  ;;  %vm216_vm9 = vcmask 1046528  }
  0x48   :  { %v209_v2 = vrot.slane %v208_v46, 4 }
  0x4a   :  { %v227_v30 = vperm.slane %v209_v2, 0  ;;  %v228_v33 = vperm.slane %v209_v2, 1  ;;  %v408_v2 = vsel %vm216_vm9, %v731_v28, %v729_v27 }
  0x4b   :  { %v409_v34 = vrot.slane %v408_v2, 7 }
  0x93   :  { %v681_v48 = vpop.f32.mrf.mxu0 }
  0x94   :  { %v683_v49 = vpop.f32.mrf.mxu1  ;;  %v251_v19 = vmul.f32 %v219_v41, %v681_v48  ;;  %v405_v41 = vrot.slane %v404_v26, 5 }
  0x95   :  { %v252_v29 = vmul.f32 %v220_v44, %v683_v49  ;;  %v406_v49 = vsel %vm213_vm8, %v729_v27, %v731_v28  ;;  %v229_v44 = vperm.slane %v212_v25, 0 }
  0x96   :  { %v421_v61 = vperm.slane %v405_v41, 1 }
  0x99   :  { %v685_v50 = vpop.f32.mrf.mxu2 }
  0x9a   :  { %v688_v52 = vpop.f32.mrf.mxu3  ;;  %v442_v35 = vmul.f32 %v410_v58, %v685_v50  ;;  %v407_v58 = vrot.slane %v406_v49, 6 }
  0x9b   :  { %v690_v53 = vpop.f32.mrf.mxu0  ;;  %v443_v42 = vmul.f32 %v411_v59, %v688_v52 }
  0x9c   :  { %v693_v55 = vpop.f32.mrf.mxu1  ;;  %v253_v36 = vmul.f32 %v221_v47, %v690_v53 }
  0x9d   :  { %v254_v48 = vmul.f32 %v222_v51, %v693_v55  ;;  %v230_v55 = vperm.slane %v212_v25, 1 }
  0x9e   :  { %v267_v51 = vadd.f32 %v253_v36, %v251_v19 }
  0x9f   :  { %v274_v54 = vadd.f32 %v254_v48, %v252_v29  ;;  %v423_v29 = vperm.slane %v407_v58, 1 }
  0xa1   :  { %v699_v62 = vpop.f32.mrf.mxu2 }
  0xa2   :  { %v704_v6 = vpop.f32.mrf.mxu3  ;;  %v444_v38 = vmul.f32 %v412_v60, %v699_v62  ;;  %v217_v62 = vsel %vm216_vm9, %v727_v5, %v725_v24  ;;  %v420_v60 = vperm.slane %v405_v41, 0 }
  0xa3   :  { %v706_v7 = vpop.f32.mrf.mxu0  ;;  %v445_v50 = vmul.f32 %v413_v63, %v704_v6  ;;  %v231_v63 = vperm.slane %v215_v45, 0 }
  0xa4   :  { %v709_v8 = vpop.f32.mrf.mxu1  ;;  %v255_v53 = vmul.f32 %v223_v1, %v706_v7  ;;  %v458_v52 = vadd.f32 %v444_v38, %v442_v35  ;;  %v232_v7 = vperm.slane %v215_v45, 1  ;;  %v218_v1 = vrot.slane %v217_v62, 7 }
  0xa5   :  { %v256_v56 = vmul.f32 %v224_v12, %v709_v8  ;;  %v465_v10 = vadd.f32 %v445_v50, %v443_v42 }
  0xa6   :  { %v268_v24 = vadd.f32 %v267_v51, %v255_v53  ;;  %v233_v35 = vperm.slane %v218_v1, 0 }
  0xa7   :  { %v275_v12 = vadd.f32 %v274_v54, %v256_v56 }
  0xa9   :  { %v715_v0 = vpop.f32.mrf.mxu2 }
  0xaa   :  { %v719_v20 = vpop.f32.mrf.mxu3  ;;  %v446_v59 = vmul.f32 %v414_v13, %v715_v0  ;;  %v422_v13 = vperm.slane %v407_v58, 0 }
  0xab   :  { %v721_v21 = vpop.f32.mrf.mxu0  ;;  %v447_v5 = vmul.f32 %v415_v14, %v719_v20  ;;  %v234_v20 = vperm.slane %v218_v1, 1 }
  0xac   :  { %v723_v23 = vpop.f32.mrf.mxu1  ;;  %v257_v8 = vmul.f32 %v225_v4, %v721_v21  ;;  %v459_v19 = vadd.f32 %v458_v52, %v446_v59 }
  0xad   :  { %v258_v17 = vmul.f32 %v226_v15, %v723_v23  ;;  %v466_v14 = vadd.f32 %v465_v10, %v447_v5 }
  0xae   :  { %v269_v21 = vadd.f32 %v268_v24, %v257_v8 }
  0xaf   :  { %v276_v15 = vadd.f32 %v275_v12, %v258_v17 }
  0xb1   :  { %v733_v11 = vpop.f32.mrf.mxu2 }
  0xb2   :  { %v739_v31 = vpop.f32.mrf.mxu3  ;;  %v448_v0 = vmul.f32 %v416_v16, %v733_v11 }
  0xb3   :  { %v741_v32 = vpop.f32.mrf.mxu0  ;;  %v449_v25 = vmul.f32 %v417_v22, %v739_v31 }
  0xb4   :  { %v750_v37 = vpop.f32.mrf.mxu1  ;;  %v259_v27 = vmul.f32 %v227_v30, %v741_v32  ;;  %v460_v16 = vadd.f32 %v459_v19, %v448_v0 }
  0xb5   :  { %v260_v4 = vmul.f32 %v228_v33, %v750_v37  ;;  %v467_v36 = vadd.f32 %v466_v14, %v449_v25 }
  0xb6   :  { %v270_v38 = vadd.f32 %v269_v21, %v259_v27 }
  0xb7   :  { %v277_v42 = vadd.f32 %v276_v15, %v260_v4 }
  0xb9   :  { %v762_v57 = vpop.f32.mrf.mxu2 }
  0xba   :  { %v767_v3 = vpop.f32.mrf.mxu3  ;;  %v450_v28 = vmul.f32 %v418_v39, %v762_v57  ;;  %v424_v57 = vperm.slane %v409_v34, 0 }
  0xbb   :  { %v769_v9 = vpop.f32.mrf.mxu0  ;;  %v451_v23 = vmul.f32 %v419_v43, %v767_v3  ;;  %v425_v43 = vperm.slane %v409_v34, 1 }
  0xbc   :  { %v774_v18 = vpop.f32.mrf.mxu1  ;;  %v261_v31 = vmul.f32 %v229_v44, %v769_v9  ;;  %v461_v39 = vadd.f32 %v460_v16, %v450_v28 }
  0xbd   :  { %v262_v48 = vmul.f32 %v230_v55, %v774_v18  ;;  %v468_v37 = vadd.f32 %v467_v36, %v451_v23 }
  0xbe   :  { %v271_v45 = vadd.f32 %v270_v38, %v261_v31 }
  0xc1   :  { %v345_v40 = vpop.f32.mrf.mxu2 }
  0xc2   :  { %v374_v46 = vpop.f32.mrf.mxu3  ;;  %v452_v22 = vmul.f32 %v420_v60, %v345_v40  ;;  %v278_v40 = vadd.f32 %v277_v42, %v262_v48 }
  0xc3   :  { %v129_v47 = vpop.f32.mrf.mxu0  ;;  %v453_v32 = vmul.f32 %v421_v61, %v374_v46 }
  0xc4   :  { %v158_v6 = vpop.f32.mrf.mxu1  ;;  %v263_v41 = vmul.f32 %v231_v63, %v129_v47  ;;  %v462_v50 = vadd.f32 %v461_v39, %v452_v22 }
  0xc5   :  { %v264_v33 = vmul.f32 %v232_v7, %v158_v6  ;;  %v469_v44 = vadd.f32 %v468_v37, %v453_v32 }
  0xc6   :  { %v272_v18 = vadd.f32 %v271_v45, %v263_v41 }
  0xc7   :  { %v279_v54 = vadd.f32 %v278_v40, %v264_v33 }
  0xc9   :  { %v348_v26 = vpop.f32.mrf.mxu2 }
  0xca   :  { %v377_v11 = vpop.f32.mrf.mxu3  ;;  %v454_v49 = vmul.f32 %v422_v13, %v348_v26 }
  0xcb   :  { %v131_v30 = vpop.f32.mrf.mxu0  ;;  %v455_v53 = vmul.f32 %v423_v29, %v377_v11 }
  0xcc   :  { %v160_v3 = vpop.f32.mrf.mxu1  ;;  %v265_v9 = vmul.f32 %v233_v35, %v131_v30  ;;  %v463_v55 = vadd.f32 %v462_v50, %v454_v49 }
  0xcd   :  { %v266_v46 = vmul.f32 %v234_v20, %v160_v3  ;;  %v470_v47 = vadd.f32 %v469_v44, %v455_v53 }
  0xce   :  { %v273_v58 = vadd.f32 %v272_v18, %v265_v9 }
  0xcf   :  { %v280_v60 = vadd.f32 %v279_v54, %v266_v46 }
  0xd1   :  { %v350_v62 = vpop.f32.mrf.mxu2 }
  0xd2   :  { %v456_v51 = vmul.f32 %v424_v57, %v350_v62  ;;  %v379_v56 = vpop.f32.mrf.mxu3 }
  0xd3   :  { %v457_v59 = vmul.f32 %v425_v43, %v379_v56 }
  0xd4   :  { %v464_v52 = vadd.f32 %v463_v55, %v456_v51 }
  0xd5   :  { %v471_v6 = vadd.f32 %v470_v47, %v457_v59 }
  0xd6   :  { %v472_v61 = vadd.f32 %v464_v52, %v273_v58 }
  0xd7   :  { %v473_v63 = vadd.f32 %v471_v6, %v280_v60 }
  0xd8   :  { %474 = vst [vmem:[#allocation2] sm:$0xff] %v472_v61 }
  0xd9   :  { %475 = vst [vmem:[#allocation2 + $0x8] sm:$0xff] %v473_v63 }
  0xda   :  { %486 = dma.vmem_to_hbm [thread:$0]  %s482_s26, 256, %s484_s29, [#allocation3]  }
  0xdb   :  { %586 = dma.done.wait [#allocation3], 256  }
  0xdc   :  { %587 = vsyncadd [#allocation3], 4294967040 }
  0xdd   :  { %491 = vsyncpa [#allocation3], 1 }

</bundles_post_ra>
